<compile_context>
chip_gen: v7x
topology: tpu7x:2x2x1
jax: 0.10.0
libtpu: 0.0.40
codegen_flags: <defaults>
</compile_context>

<pallas_src>
import functools

import jax
import jax.numpy as jnp
from jax.experimental import pallas as pl
from jax.experimental.pallas import tpu as pltpu


# ----------------------------------------------------------------------------
# Counter-based hash PRNG (pure function of (seed, global row, global col)).
# ----------------------------------------------------------------------------
_M1 = 0x9E3779B1
_M2 = 0x85EBCA77
_M3 = 0xC2B2AE3D
_F1 = 0x85EBCA6B


def _hash_bits(shape, seed_u32, row_offset, col_offset):
    """Uniform uint32 bits, deterministic per (seed, global_row, global_col).

    A single xorshift/mul/xorshift finisher (instead of the full murmur
    fmix32) keeps mask generation ~25% cheaper on the VALU while remaining
    plenty random for dropout.
    """
    rows = (jax.lax.broadcasted_iota(jnp.int32, shape, 0) + row_offset).astype(jnp.uint32)
    cols = (jax.lax.broadcasted_iota(jnp.int32, shape, 1) + col_offset).astype(jnp.uint32)
    x = rows * jnp.uint32(_M1) + cols * jnp.uint32(_M2) + seed_u32 * jnp.uint32(_M3)
    x = x ^ (x >> 16)
    x = x * jnp.uint32(_F1)
    x = x ^ (x >> 15)
    return x


def _keep_threshold(p: float) -> jnp.uint32:
    # keep iff bits >= threshold  =>  P(keep) = 1 - p.
    # NOTE: clipped to 0xFFFFFFFF, so for p within ~2^-32 of 1 the keep
    # probability collapses to ~2^-32 instead of exactly 1-p; negligible, and
    # p == 1 is special-cased in the wrapper.
    return jnp.uint32(min(int(round(p * 4294967296.0)), 4294967295))


# ----------------------------------------------------------------------------
# Kernel
# ----------------------------------------------------------------------------
def _drop_matmul_kernel(seed_ref, lhs_ref, rhs_ref, out_ref, acc_ref, *cache,
                        p: float, apply_dropout: bool, lhs_resident: bool,
                        tk: int, compute_dtype):
    i = pl.program_id(0)
    j = pl.program_id(1)
    k = pl.program_id(2)
    nk = pl.num_programs(2)

    @pl.when(k == 0)
    def _init():
        acc_ref[...] = jnp.zeros_like(acc_ref)

    tm = acc_ref.shape[0]

    if apply_dropout:
        threshold = _keep_threshold(p)
        seed_u32 = seed_ref[0].astype(jnp.uint32)
        row0 = i * tm  # global row offset of this row block

        if lhs_resident:
            # lhs_ref is the whole (tm, K) row strip (fetched from HBM once
            # per i, since its block index never changes across j and k).
            cache_ref = cache[0]
            n_k = cache_ref.shape[0]  # static Python int

            @pl.when((j == 0) & (k == 0))
            def _fill():
                # Mask the whole strip once per i using *static* lane slices,
                # storing one (tm, tk) slab per k into the VMEM cache.
                for kk in range(n_k):
                    x = lhs_ref[:, kk * tk:(kk + 1) * tk]
                    bits = _hash_bits((tm, tk), seed_u32, row0, kk * tk)
                    cache_ref[kk] = jnp.where(bits >= threshold, x,
                                              jnp.zeros_like(x))

            lhs = cache_ref[k]  # reused for every j and every k
        else:
            # Fallback (huge K that does not fit the VMEM budget, or nj == 1):
            # recompute the mask per tile.  Mask depends only on
            # (seed, global element index), so every j sees the same mask.
            x = lhs_ref[...]
            bits = _hash_bits(x.shape, seed_u32, row0, k * tk)
            lhs = jnp.where(bits >= threshold, x, jnp.zeros_like(x))
    else:
        lhs = lhs_ref[...]

    rhs = rhs_ref[...]
    if compute_dtype is not None:
        lhs = lhs.astype(compute_dtype)
        rhs = rhs.astype(compute_dtype)

    acc_ref[...] += jnp.dot(lhs, rhs, preferred_element_type=jnp.float32)

    @pl.when(k == nk - 1)
    def _finalize():
        acc = acc_ref[...]
        if apply_dropout:
            # Survivor scale applied once, in f32, on the accumulator.
            acc = acc * (1.0 / (1.0 - p))
        out_ref[...] = acc.astype(out_ref.dtype)


# ----------------------------------------------------------------------------
# Wrapper helpers
# ----------------------------------------------------------------------------
def _round_up(x: int, m: int) -> int:
    return ((x + m - 1) // m) * m


def _sublane_min(dtype) -> int:
    isz = jnp.dtype(dtype).itemsize
    return {4: 8, 2: 16, 1: 32}.get(isz, 8)


def _vmem_capacity_bytes() -> int:
    try:
        return int(pltpu.get_tpu_info().vmem_capacity_bytes)
    except Exception:
        return 64 << 20  # conservative (v7x-sized) default


def _choose_tm(m: int, sub: int) -> int:
    m_pad = _round_up(m, sub)
    cands = [c for c in (256, 128, 64, 32, 16, 8) if c % sub == 0 and c <= m_pad]
    if not cands:
        cands = [min(m_pad, 256)]
    # Prefer >= 2 row blocks (keeps both v7x TensorCores busy along the
    # "parallel" i axis) as long as the tile stays a healthy MXU height.
    for c in cands:
        if c >= 64 and -(-m_pad // c) >= 2:
            return c
    return cands[0]


def _choose_lane_tile(n: int, cap: int) -> int:
    n_pad = _round_up(n, 128)
    for c in (1024, 512, 384, 256, 128):
        if c <= cap and c <= n_pad and n_pad % c == 0:
            return c
    return 128


# ----------------------------------------------------------------------------
# Wrapper
# ----------------------------------------------------------------------------
def drop_matmul(lhs, rhs, p: float = 0.5, training: bool = True, seed: int = 0,
                *, tm: int = None, tn: int = None, tk: int = None,
                mxu_dtype=None):
    """Fused dropout(lhs, p) @ rhs on TPU via Pallas."""
    M, K = lhs.shape
    K2, N = rhs.shape
    if K != K2:
        raise ValueError("inner dims must match")
    if not (0.0 <= p <= 1.0):
        raise ValueError(f"dropout probability must be in [0, 1], got {p}")

    out_dtype = lhs.dtype
    seed = int(seed) & 0x7FFFFFFF

    # p == 1 in training mode drops everything -> output is exactly zero.
    if training and p >= 1.0:
        return jnp.zeros((M, N), dtype=out_dtype)

    apply_dropout = bool(training) and (0.0 < p < 1.0)

    lhs_isz = jnp.dtype(lhs.dtype).itemsize
    rhs_isz = jnp.dtype(rhs.dtype).itemsize
    out_isz = jnp.dtype(out_dtype).itemsize

    # Generation-aware VMEM budgeting: 128 MiB/core on v5e/v6e, 64 MiB on v7x.
    vmem_cap = _vmem_capacity_bytes()
    big_vmem = vmem_cap >= (100 << 20)
    vmem_budget = int(0.75 * vmem_cap)

    sub = _sublane_min(lhs.dtype)
    tm = _round_up(tm, sub) if tm is not None else _choose_tm(M, sub)
    tn = _round_up(tn, 128) if tn is not None else _choose_lane_tile(N, 512 if big_vmem else 256)
    tk = _round_up(tk, 128) if tk is not None else _choose_lane_tile(K, 1024 if big_vmem else 512)

    # Pad to tile multiples: lane dims stay >= 128 (dense vst, no masked
    # partial stores), sublane dims respect the dtype packing minimum.  Zero
    # padding in K contributes nothing to the product; padded rows/cols of
    # the output are sliced off.  The mask uses global (row, col), so real
    # elements keep the same mask as in the unpadded problem.
    Mp, Kp, Np = _round_up(M, tm), _round_up(K, tk), _round_up(N, tn)
    ni, nj, nk = Mp // tm, Np // tn, Kp // tk
    grid = (ni, nj, nk)

    def _estimate(resident: bool) -> int:
        lhs_block = tm * (Kp if resident else tk) * lhs_isz
        cache = tm * Kp * lhs_isz if resident else 0  # masked-strip cache
        return (2 * lhs_block + 2 * tk * tn * rhs_isz + 2 * tm * tn * out_isz
                + tm * tn * 4 + cache)

    # Keep the whole (tm, K) lhs row strip + masked cache VMEM-resident when
    # dropout is active, more than one output-column block exists and the
    # budget allows: lhs is then fetched from HBM once and masked once per
    # (i, k), instead of once per j.
    # TODO(synk): for K beyond the VMEM budget an (i, k, j)-ordered grid with
    # a row-strip accumulator would still avoid the refetch; not implemented.
    lhs_resident = apply_dropout and nj >= 2 and _estimate(True) <= vmem_budget
    est_bytes = _estimate(lhs_resident)

    vmem_limit = int(min(0.85 * vmem_cap, max(2 * est_bytes, 32 << 20)))
    vmem_limit = int(max(vmem_limit, est_bytes + (4 << 20)))

    # The masked cache is filled at (j==0, k==0) and consumed at later j/k,
    # so j must stay on one core when resident; i remains "parallel".
    dim_sem = ("parallel",
               "arbitrary" if lhs_resident else "parallel",
               "arbitrary")

    cost = pl.CostEstimate(
        flops=2 * Mp * Np * Kp,
        transcendentals=0,
        bytes_accessed=(Mp * Kp * lhs_isz * (1 if lhs_resident else nj)
                        + Kp * Np * rhs_isz * ni + Mp * Np * out_isz),
    )

    compute_dtype = None
    if mxu_dtype is not None and jnp.dtype(mxu_dtype) != jnp.dtype(lhs.dtype):
        compute_dtype = jnp.dtype(mxu_dtype)

    kernel = functools.partial(
        _drop_matmul_kernel, p=float(p), apply_dropout=apply_dropout,
        lhs_resident=lhs_resident, tk=tk, compute_dtype=compute_dtype)

    lhs_p = lhs if (Mp == M and Kp == K) else jnp.pad(lhs, ((0, Mp - M), (0, Kp - K)))
    rhs_p = rhs if (Kp == K and Np == N) else jnp.pad(rhs, ((0, Kp - K), (0, Np - N)))
    seed_arr = jnp.asarray([seed], dtype=jnp.int32)

    if lhs_resident:
        lhs_spec = pl.BlockSpec((tm, Kp), lambda i, j, k, s: (i, 0))
    else:
        lhs_spec = pl.BlockSpec((tm, tk), lambda i, j, k, s: (i, k))

    scratch_shapes = [pltpu.VMEM((tm, tn), jnp.float32)]
    if lhs_resident:
        scratch_shapes.append(pltpu.VMEM((nk, tm, tk), lhs.dtype))

    # TODO(synk): perf review also suggests pipeline_mode=pl.Buffered(3) on
    # the streamed rhs BlockSpec to hide DMA when mem-bound (v5e/v6e); left
    # at the default double-buffering here for lowering safety.
    out_p = pl.pallas_call(
        kernel,
        out_shape=jax.ShapeDtypeStruct((Mp, Np), out_dtype),
        grid_spec=pltpu.PrefetchScalarGridSpec(
            num_scalar_prefetch=1,
            grid=grid,
            in_specs=[
                lhs_spec,
                pl.BlockSpec((tk, tn), lambda i, j, k, s: (k, j)),
            ],
            out_specs=pl.BlockSpec((tm, tn), lambda i, j, k, s: (i, j)),
            scratch_shapes=scratch_shapes,
        ),
        compiler_params=pltpu.CompilerParams(
            dimension_semantics=dim_sem,
            vmem_limit_bytes=vmem_limit),
        cost_estimate=cost,
    )(seed_arr, lhs_p, rhs_p)

    if Mp != M or Np != N:
        out_p = out_p[:M, :N]
    return out_p


# Pure-JAX reference using the exact same hash RNG (for testing).
def _reference_drop_matmul(lhs, rhs, p, training, seed):
    if (not training) or p <= 0.0:
        return jnp.dot(lhs, rhs)
    if p >= 1.0:
        return jnp.zeros((lhs.shape[0], rhs.shape[1]), lhs.dtype)
    seed = int(seed) & 0x7FFFFFFF
    bits = _hash_bits(lhs.shape, jnp.uint32(seed), 0, 0)
    keep = bits >= _keep_threshold(p)
    dropped = jnp.where(keep, lhs, jnp.zeros_like(lhs)) * (1.0 / (1.0 - p))
    return jnp.dot(dropped, rhs)


class DropMatmul:
    """JAX/Pallas port of light_attention.nn.modules.DropMatmul."""

    def __init__(self, p: float = 0.5, inplace: bool = False):
        if inplace:
            raise NotImplementedError('There is no in-place variant.')
        self.p = p
        self.training = True

    def eval(self):
        self.training = False
        return self

    def train(self):
        self.training = True
        return self

    def __call__(self, lhs, rhs, seed: int = 0):
        return drop_matmul(lhs, rhs, self.p, self.training, seed=seed)

    def __repr__(self):
        return 'DropMatmul(p={})'.format(self.p)


if __name__ == "__main__":
    key = jax.random.PRNGKey(0)
    k1, k2, k3, k4 = jax.random.split(key, 4)

    # Small, TPU-tile friendly shapes.
    M, K, N = 256, 512, 512
    lhs = jax.random.normal(k1, (M, K), dtype=jnp.float32)
    rhs = jax.random.normal(k2, (K, N), dtype=jnp.float32)

    mod = DropMatmul(p=0.5)

    # eval mode: must match a plain matmul (no dropout applied).
    out_eval = jax.block_until_ready(mod.eval()(lhs, rhs))
    ref_eval = jnp.dot(lhs, rhs)
    assert out_eval.shape == (M, N)
    assert jnp.allclose(out_eval, ref_eval, rtol=2e-2, atol=2e-1), "eval path mismatch"

    # training mode (default tiles): fused in-kernel dropout + matmul.
    seed = 1234
    out_train = jax.block_until_ready(mod.train()(lhs, rhs, seed=seed))
    ref_train = _reference_drop_matmul(lhs, rhs, 0.5, True, seed)
    assert out_train.shape == (M, N)
    assert bool(jnp.all(jnp.isfinite(out_train)))
    assert jnp.allclose(out_train, ref_train, rtol=2e-2, atol=2e-1), "train path mismatch"
    # dropout must actually change the result when p > 0.
    assert not jnp.allclose(out_train, ref_eval, rtol=1e-3, atol=1e-3)

    # training mode, explicit small tiles: forces a multi-block (i, j, k) grid
    # and the VMEM-resident masked-lhs path on every chip generation.
    out_train_b = jax.block_until_ready(
        drop_matmul(lhs, rhs, 0.5, True, seed, tm=128, tn=128, tk=128))
    assert jnp.allclose(out_train_b, ref_train, rtol=2e-2, atol=2e-1), \
        "resident-cache path mismatch"

    # p = 1.0 guard: everything dropped -> zeros (like torch dropout with p=1).
    out_p1 = jax.block_until_ready(drop_matmul(lhs, rhs, p=1.0, training=True))
    assert out_p1.shape == (M, N) and bool(jnp.all(out_p1 == 0))

    # Non-(8,128)-divisible shapes exercise the padding path.
    Mo, Ko, No = 200, 520, 300
    lhs_o = jax.random.normal(k3, (Mo, Ko), dtype=jnp.float32)
    rhs_o = jax.random.normal(k4, (Ko, No), dtype=jnp.float32)
    out_o_eval = jax.block_until_ready(drop_matmul(lhs_o, rhs_o, p=0.5, training=False))
    assert out_o_eval.shape == (Mo, No)
    assert jnp.allclose(out_o_eval, jnp.dot(lhs_o, rhs_o), rtol=2e-2, atol=2e-1), \
        "padded eval mismatch"
    out_o_train = jax.block_until_ready(drop_matmul(lhs_o, rhs_o, p=0.3, training=True, seed=7))
    ref_o_train = _reference_drop_matmul(lhs_o, rhs_o, 0.3, True, 7)
    assert out_o_train.shape == (Mo, No)
    assert jnp.allclose(out_o_train, ref_o_train, rtol=2e-2, atol=2e-1), \
        "padded train mismatch"

    print("KERNEL_OK")
</pallas_src>

<mosaic_0001>
module attributes {stable_mosaic.version = 11 : i64} {
  func.func @_drop_matmul_kernel(%arg0: i32, %arg1: i32, %arg2: i32, %arg3: memref<1xi32, #tpu.memory_space<smem>>, %arg4: memref<128x512xf32, #tpu.memory_space<vmem>>, %arg5: memref<512x256xf32, #tpu.memory_space<vmem>>, %arg6: memref<128x256xf32, #tpu.memory_space<vmem>>, %arg7: memref<128x256xf32, #tpu.memory_space<vmem>>) attributes {dimension_semantics = [#tpu.dimension_semantics<parallel>, #tpu.dimension_semantics<parallel>, #tpu.dimension_semantics<arbitrary>], iteration_bounds = array<i64: 2, 2, 1>, scalar_prefetch = 1 : i64, scratch_operands = 1 : i64, tpu.core_type = #tpu.core_type<tc>, window_params = [{transform_indices = @transform_0, window_bounds = array<i64: 128, 512>}, {transform_indices = @transform_1, window_bounds = array<i64: 512, 256>}, {transform_indices = @transform_2, window_bounds = array<i64: 128, 256>}]} {
    %c0_i32 = arith.constant 0 : i32
    %0 = arith.cmpi eq, %arg2, %c0_i32 : i32
    %1 = arith.extui %0 : i1 to i32
    %c0_i32_0 = arith.constant 0 : i32
    %2 = arith.cmpi ne, %1, %c0_i32_0 : i32
    scf.if %2 {
      %cst_10 = arith.constant 0.000000e+00 : f32
      %12 = vector.broadcast %cst_10 : f32 to vector<128x256xf32>
      %c0_11 = arith.constant 0 : index
      %c0_12 = arith.constant 0 : index
      %13 = vector.load %arg7[%c0_11, %c0_12] : memref<128x256xf32, #tpu.memory_space<vmem>>, vector<128x256xf32>
      tpu.vector_store %arg7[%c0_11, %c0_12], %12 {strides = array<i32>} : memref<128x256xf32, #tpu.memory_space<vmem>>, vector<128x256xf32>,
    } else {
    }
    %c0 = arith.constant 0 : index
    %c0_1 = arith.constant 0 : index
    %3 = vector.load %arg4[%c0, %c0_1] : memref<128x512xf32, #tpu.memory_space<vmem>>, vector<128x512xf32>
    %c0_2 = arith.constant 0 : index
    %c0_3 = arith.constant 0 : index
    %4 = vector.load %arg5[%c0_2, %c0_3] : memref<512x256xf32, #tpu.memory_space<vmem>>, vector<512x256xf32>
    %c0_4 = arith.constant 0 : index
    %c0_5 = arith.constant 0 : index
    %5 = vector.load %arg7[%c0_4, %c0_5] : memref<128x256xf32, #tpu.memory_space<vmem>>, vector<128x256xf32>
    %cst = arith.constant dense<0.000000e+00> : vector<128x256xf32>
    %6 = tpu.matmul %3, %4, %cst {dimension_numbers = #tpu.dot_dimension_numbers<[1], [0], [0], [1], [0, 0, 1, 1], [], []>} : vector<128x512xf32>, vector<512x256xf32>, vector<128x256xf32> -> vector<128x256xf32>
    %7 = arith.addf %5, %6 : vector<128x256xf32>
    %c0_6 = arith.constant 0 : index
    %c0_7 = arith.constant 0 : index
    %8 = vector.load %arg7[%c0_6, %c0_7] : memref<128x256xf32, #tpu.memory_space<vmem>>, vector<128x256xf32>
    tpu.vector_store %arg7[%c0_6, %c0_7], %7 {strides = array<i32>} : memref<128x256xf32, #tpu.memory_space<vmem>>, vector<128x256xf32>,
    %c0_i32_8 = arith.constant 0 : i32
    %9 = arith.cmpi eq, %arg2, %c0_i32_8 : i32
    %10 = arith.extui %9 : i1 to i32
    %c0_i32_9 = arith.constant 0 : i32
    %11 = arith.cmpi ne, %10, %c0_i32_9 : i32
    scf.if %11 {
      %c0_10 = arith.constant 0 : index
      %c0_11 = arith.constant 0 : index
      %12 = vector.load %arg7[%c0_10, %c0_11] : memref<128x256xf32, #tpu.memory_space<vmem>>, vector<128x256xf32>
      %c0_12 = arith.constant 0 : index
      %c0_13 = arith.constant 0 : index
      %13 = vector.load %arg6[%c0_12, %c0_13] : memref<128x256xf32, #tpu.memory_space<vmem>>, vector<128x256xf32>
      tpu.vector_store %arg6[%c0_12, %c0_13], %12 {strides = array<i32>} : memref<128x256xf32, #tpu.memory_space<vmem>>, vector<128x256xf32>,
    } else {
    }
    return
  }
  func.func @transform_0(%arg0: i32, %arg1: i32, %arg2: i32, %arg3: memref<1xi32, #tpu.memory_space<smem>>) -> (i32, i32) {
    %c0_i32 = arith.constant 0 : i32
    return %arg0, %arg2 : i32, i32
  }
  func.func @transform_1(%arg0: i32, %arg1: i32, %arg2: i32, %arg3: memref<1xi32, #tpu.memory_space<smem>>) -> (i32, i32) {
    %c0_i32 = arith.constant 0 : i32
    return %arg2, %arg1 : i32, i32
  }
  func.func @transform_2(%arg0: i32, %arg1: i32, %arg2: i32, %arg3: memref<1xi32, #tpu.memory_space<smem>>) -> (i32, i32) {
    %c0_i32 = arith.constant 0 : i32
    return %arg0, %arg1 : i32, i32
  }
}

</mosaic_0001>

<bundles_post_ra>
// kernel: tpu_custom_call.1
= control target key start
LH: loop header
LB: loop body
LE: loop exit
PB: predicated region body
PF: predicated region fallthrough
CT: control target
= control target key end

     0   :  { %s2234_s0 = inlined_call_operand.<no memory space> [shape: s32[1], index: 0, kind: input, shape index: {}]   ;;  %s2235_s1 = inlined_call_operand.hbm [shape: f32[256,512], index: 1, kind: input, shape index: {}]   ;;  %s2236_s2 = inlined_call_operand.hbm [shape: f32[512,512], index: 2, kind: input, shape index: {}]   ;;  %s2237_s3 = inlined_call_operand.hbm [shape: f32[256,512], index: 3, kind: output, shape index: {}]  }
   0x1   :  { %2250 = sst [smem:[#allocation20_spill]] %s2235_s1 }
   0x2   :  { %2251 = sst [smem:[#allocation21_spill]] %s2237_s3 }
   0x3   :  { %9 = vsyncpa [#allocation6], 0 }
   0x4   :  { %11 = vsyncpa [#allocation6 + $0x1], 0 }
   0x5   :  { %12 = vsyncpa [#allocation9], 0 }
   0x6   :  { %14 = vsyncpa [#allocation9 + $0x1], 0 }
   0x7   :  { %15 = vsyncpa [#allocation7], 0 }
   0x8   :  { %17 = vsyncpa [#allocation7 + $0x1], 0  ;;  %s1656_s12 = smov 0   ;;  %s1658_s13 = smov 0  }
   0x9   :  { %s1660_s0 = smov 0   ;;  %s1662_s14 = smov 0  }
   0xa   :  { %s1664_s15 = smov 0   ;;  %s1666_s16 = smov 0  }
   0xb   :  { %s1668_s17 = smov 0   ;;  %s1670_s18 = smov 0  }
   0xc   :  { %s1672_s19 = smov 0   ;;  %s1674_s20 = smov 0  }
   0xd   :  { %s1676_s21 = smov 0   ;;  %s1678_s22 = smov 0  }
   0xe   :  { %s1680_s23 = smov 0   ;;  %s1682_s24 = smov 0  }
   0xf LB: > { %2252 = sst [smem:[#allocation14_spill]] %s1612_s21  ;;  %s1090_s25 = sadd.s32 4294967295, %s1624_s24   ;;  %s1624_s24 = sphi %s1682_s24, %s23_s24   ;;  %s1620_s23 = sphi %s1680_s23, %s2285_s23   ;;  %s1616_s22 = sphi %s1678_s22, %s2297_s22   ;;  %s1612_s21 = sphi %s1676_s21, %s2296_s21   ;;  %s1608_s20 = sphi %s1674_s20, %s2295_s20   ;;  %s1604_s19 = sphi %s1672_s19, %s2294_s19   ;;  %s1600_s18 = sphi %s1670_s18, %s2293_s18   ;;  %s1596_s17 = sphi %s1668_s17, %s2292_s17   ;;  %s1592_s16 = sphi %s1666_s16, %s2291_s16   ;;  %s1588_s15 = sphi %s1664_s15, %s2290_s15   ;;  %s1584_s14 = sphi %s1662_s14, %s2289_s14   ;;  %s1580_s0 = sphi %s1660_s0, %s2288_s0   ;;  %s1576_s13 = sphi %s1658_s13, %s2287_s13   ;;  %s1572_s12 = sphi %s1656_s12, %s2286_s12  }
  0x10   : > { %2253 = sst [smem:[#allocation15_spill]] %s1620_s23  ;;  %s42_s26 = sadd.s32 1, %s1620_s23 }
  0x11   : > { %p58_p0 = scmp.ne.s32.totalorder %s1604_s19, %s1600_s18  ;;  %p2239_p1 = scmp.eq.s32.totalorder %s1624_s24, 0 }
  0x12   : > { %p64_p2 = scmp.ne.s32.totalorder %s1600_s18, %s1596_s17  ;;  %p1731_p3 = scmp.eq.s32.totalorder %s1090_s25, 0 }
  0x13   : > { %p1735_p4 = scmp.eq.s32.totalorder %s1090_s25, 3  ;;  %p60_p5 = por %p2239_p1, %p58_p0 }
  0x14   : > { %p1743_p6 = por %p1731_p3, %p64_p2  ;;  %p2238_p7 = scmp.lt.s32.totalorder %s1624_s24, 4 }
  0x15   : > { %s2255_s29 = scalar_select %p1735_p4, 1, 0 }
  0x16   : > { %s2256_s30 = scalar_select %p1743_p6, 1, 0 }
  0x17   : > { %s144_s4 = sand.u32 1, %s1604_s19   ;;  %s1113_s5 = sshll.u32 %s1620_s23, 13 }
  0x18   : > { %s1094_s6 = sshll.u32 %s144_s4, 9  ;;  %s2257_s1 = sld [smem:[#allocation20_spill]] }
  0x19   : > { %s148_s10 = scalar_lea.vmem [#allocation5], %s1094_s6  ;;  %p1757_p8 = pnand %p2238_p7, %p60_p5 }
  0x1a   : > { %s158_s11 = sshll.u32 %s148_s10, 4  ;;  %s1763_s25 = scalar_lea.sflag [#allocation6], %s144_s4  ;;  %s1761_s11 = int_to_ptr.vmem [resolvable:$true] %s158_s11 }
  0x1b   : > { %p1416_p10 = pneg %p1757_p8 }
  0x1e   : > { %s1753_s9 = scalar_lea.hbm %s2257_s1, %s1113_s5  ;;  %s1419_s8 = scalar_lea.hbm %s2257_s1, 16384 }
  0x1f   : > { %s1414_s7 = scalar_lea.hbm %s1753_s9, 8192  ;;  %p1420_p13 = scmp.lt.u32.totalorder %s1753_s9, %s2257_s1 }
  0x20   : > { %p1415_p9 = scmp.ne.s32.totalorder %s1753_s9, %s1414_s7  ;;  %p1421_p0 = scmp.lt.u32.totalorder %s1419_s8, %s1414_s7 }
  0x21   : > { %p1423_p5 = scmp.lt.u32.totalorder %s1414_s7, %s1753_s9 }
  0x22   : > { %p1417_p11 = pnand %p1416_p10, %p1415_p9  ;;  %p1422_p2 = por %p1421_p0, %p1420_p13 }
  0x24   : > { %p1418_p12 = pneg %p1417_p11  ;;  %p1424_p7 = por %p1423_p5, %p1422_p2 }
  0x26   : > { %p1425_p1 = pnand %p1424_p7, %p1418_p12 }
  0x28   : > { %1428 = shalt.err (!%p1425_p1)
}
  0x29   : > { %s1429_s4 = scalar_lea.vmem %s1761_s11, 8192  ;;  %s1626_s5 = smov [#allocation5]  }
  0x2a   : > { %p1430_p9 = scmp.ne.s32.totalorder %s1761_s11, %s1429_s4  ;;  %s1434_s6 = sshll.u32 %s1626_s5, 4  ;;  %s1435_s6 = int_to_ptr.vmem [resolvable:$false] %s1434_s6 }
  0x2b   : > { %s1436_s27 = scalar_lea.vmem %s1435_s6, 16384  ;;  %p1437_p4 = scmp.lt.s32.totalorder %s1761_s11, %s1435_s6 }
  0x2c   : > { %p1432_p11 = pnand %p1430_p9, %p1416_p10  ;;  %p1438_p13 = scmp.lt.s32.totalorder %s1436_s27, %s1429_s4 }
  0x2e   : > { %p1433_p6 = pneg %p1432_p11  ;;  %p1439_p0 = por %p1438_p13, %p1437_p4 }
  0x30   : > { %p1440_p2 = pnand %p1439_p0, %p1433_p6 }
  0x32   : > { %1443 = shalt.err (!%p1440_p2)
}
  0x33   : > { %s2241_s7 = smov 512   ;;  %s1628_s8 = smov 32  }
  0x34   : > { %1285 = dma.hbm_to_vmem [thread:$0]  (!%p1757_p8), %s1753_s9, 8192, %s1761_s11, %s1763_s25, %s2241_s7, %s2241_s7, %s1628_s8  }
  0x35   : > { %p1101_p1 = scmp.ge.s32.totalorder %s1624_s24, 1  ;;  %p190_p4 = scmp.lt.s32.totalorder %s1624_s24, 5 }
  0x36   : > { %s1091_s4 = sadd.s32 4294967294, %s1624_s24   ;;  %s38_s5 = sadd.s32 1, %s1616_s22 }
  0x37   : > { %p1795_p6 = pnand %p1101_p1, %p190_p4  ;;  %s79_s6 = sadd.s32 1, %s1592_s16 }
  0x38   : > { %p40_p7 = scmp.ge.s32.totalorder %s38_s5, 2  ;;  %p86_p10 = scmp.ne.s32.totalorder %s1592_s16, %s1588_s15 }
  0x39   : > { %p92_p12 = scmp.ne.s32.totalorder %s1588_s15, %s1584_s14  ;;  %s107_s17 = sadd.s32 1, %s1580_s0 }
  0x3a   : > { %s2299_s5 = smov (%p40_p7, %s38_s5), 0  ;;  %s2301_s26 = smov (!%p40_p7, %s42_s26), %s1620_s23 }
  0x3b   : > { %2260 = sst [smem:[#allocation16_spill]] %s2299_s5  ;;  %s75_s9 = ssub.s32 %s1616_s22, %s2299_s5 }
  0x3c   : > { %p2261_p8 = scmp.eq.s32.totalorder %s1624_s24, 0  ;;  %p44_p9 = scmp.ge.s32.totalorder %s2301_s26, 2 }
  0x3d   : > { %p77_p11 = scmp.eq.s32.totalorder %s75_s9, 0  ;;  %p1822_p13 = por %p92_p12, %p1731_p3 }
  0x3e   : > { %p1816_p5 = por %p86_p10, %p2261_p8  ;;  %p117_p0 = scmp.ne.s32.totalorder %s1580_s0, %s1576_s13 }
  0x3f   : > { %s2263_s14 = scalar_select %p1822_p13, 1, 0 }
  0x40   : > { %s2303_s26 = smov (%p44_p9, %s2301_s26), 0  ;;  %p2266_p2 = scmp.ne.s32.totalorder %s2255_s29, 0 }
  0x41   : > { %2264 = sst [smem:[#allocation17_spill]] %s2303_s26  ;;  %s46_s27 = ssub.s32 %s1620_s23, %s2303_s26 }
  0x42   : > { %s1831_s25 = scalar_select %p77_p11, %s1592_s16, %s79_s6  }
  0x43   : > { %p1837_p1 = por %p2266_p2, %p117_p0  ;;  %p49_p4 = scmp.eq.s32.totalorder %s46_s27, 0 }
  0x44   : > { %2265 = sst [smem:[#allocation18_spill]] %s1831_s25  ;;  %s104_s28 = sor.u32 %s75_s9, %s46_s27 }
  0x45   : > { %s2267_s8 = scalar_select %p1837_p1, 1, 0 }
  0x46   : > { %p105_p3 = scmp.eq.s32.totalorder %s104_s28, 0  ;;  %p123_p7 = scmp.ne.s32.totalorder %s1576_s13, %s1572_s12 }
  0x47   : > { %2268 = sst [smem:[#allocation19_spill]] %s2267_s8  ;;  %s2269_s7 = sadd.s32 1, %s1604_s19 }
  0x48   : > { %s1846_s1 = scalar_select %p49_p4, %s1604_s19, %s2269_s7  }
  0x49   : > { %s1849_s5 = scalar_select %p105_p3, %s1580_s0, %s107_s17  }
  0x4a   : > { %p124_p10 = scmp.eq.s32.totalorder %s1091_s4, 3  ;;  %s168_s6 = sand.u32 1, %s1592_s16  }
  0x4b   : > { %s1098_s25 = sshll.u32 %s168_s6, 10  ;;  %s1114_s26 = sshll.u32 %s1616_s22, 8 }
  0x4c   : > { %p1852_p12 = por %p124_p10, %p123_p7  ;;  %s172_s23 = scalar_lea.vmem [#allocation8], %s1098_s25 }
  0x4d   : > { %s182_s3 = sshll.u32 %s172_s23, 4  ;;  %s1860_s9 = scalar_lea.hbm %s2236_s2, %s1114_s26  ;;  %s1862_s3 = int_to_ptr.vmem [resolvable:$true] %s182_s3 }
  0x4e   : > { %s2270_s29 = scalar_select %p1852_p12, 1, 0 }
  0x4f   : > { %p2271_p8 = scmp.lt.s32.totalorder %s1624_s24, 4  ;;  %s1872_s23 = scalar_lea.sflag [#allocation9], %s168_s6 }
  0x50   : > { %s1444_s4 = scalar_lea.hbm %s1860_s9, 16384  ;;  %s1449_s17 = scalar_lea.hbm %s2236_s2, 32768 }
  0x51   : > { %p1868_p9 = pnand %p2271_p8, %p1816_p5  ;;  %p1445_p11 = scmp.ne.s32.totalorder %s1860_s9, %s1444_s4 }
  0x52   : > { %p1450_p5 = scmp.lt.u32.totalorder %s1860_s9, %s2236_s2  ;;  %p1451_p3 = scmp.lt.u32.totalorder %s1449_s17, %s1444_s4 }
  0x53   : > { %p1446_p0 = pneg %p1868_p9  ;;  %p1453_p10 = scmp.lt.u32.totalorder %s1444_s4, %s1860_s9 }
  0x54   : > { %p1452_p7 = por %p1451_p3, %p1450_p5 }
  0x55   : > { %p1447_p2 = pnand %p1446_p0, %p1445_p11 }
  0x56   : > { %p1454_p8 = por %p1453_p10, %p1452_p7 }
  0x57   : > { %p1448_p4 = pneg %p1447_p2 }
  0x59   : > { %p1455_p12 = pnand %p1454_p8, %p1448_p4 }
  0x5b   : > { %1458 = shalt.err (!%p1455_p12)
}
  0x5c   : > { %s1459_s27 = scalar_lea.vmem %s1862_s3, 16384  ;;  %s1629_s8 = smov [#allocation8]  }
  0x5d   : > { %p1460_p11 = scmp.ne.s32.totalorder %s1862_s3, %s1459_s27  ;;  %s1464_s28 = sshll.u32 %s1629_s8, 4  ;;  %s1465_s28 = int_to_ptr.vmem [resolvable:$false] %s1464_s28 }
  0x5e   : > { %s1466_s6 = scalar_lea.vmem %s1465_s28, 32768  ;;  %p1467_p13 = scmp.lt.s32.totalorder %s1862_s3, %s1465_s28 }
  0x5f   : > { %p1462_p2 = pnand %p1460_p11, %p1446_p0  ;;  %p1468_p5 = scmp.lt.s32.totalorder %s1466_s6, %s1459_s27 }
  0x61   : > { %p1463_p1 = pneg %p1462_p2  ;;  %p1469_p3 = por %p1468_p5, %p1467_p13 }
  0x63   : > { %p1470_p7 = pnand %p1469_p3, %p1463_p1 }
  0x65   : > { %1473 = shalt.err (!%p1470_p7)
}
  0x66   : > { %s1630_s4 = smov 256   ;;  %s1631_s21 = smov 16  }
  0x67   : > { %s2273_s26 = smov 512   ;;  %194 = sbr.rel (%p1795_p6) target bundleno = 475 (0x1db), region = 28 }
  0x68   : > { %1288 = dma.hbm_to_vmem [thread:$0]  (!%p1868_p9), %s1860_s9, 16384, %s1862_s3, %s1872_s23, %s2273_s26, %s1630_s4, %s1631_s21  }
  0x69   : > { %s196_s17 = sand.u32 (!%p1795_p6), 1, %s1600_s18   ;;  %p2274_p13 = scmp.ne.s32.totalorder (!%p1795_p6), %s2256_s30, 0 }
  0x6a   : > { %s1102_s11 = sshll.u32 (!%p1795_p6), %s196_s17, 9  ;;  %s197_s25 = scalar_lea.sflag (!%p1795_p6), [#allocation6], %s196_s17 }
  0x6b   : > { %s1904_s27 = scalar_lea.vmem (!%p1795_p6), [#allocation5], %s1102_s11 }
  0x6e   : > { %1559 = dma.done.wait (%p2274_p13), %s197_s25, 8192  }
  0x6f   : > { %1561 = vsyncadd (%p2274_p13), %s197_s25, 4294959104  ;;  %s205_s7 = sand.u32 1, %s1588_s15   ;;  %p2275_p6 = scmp.ne.s32.totalorder %s2263_s14, 0 }
  0x70   : > { %s1103_s8 = sshll.u32 %s205_s7, 10  ;;  %s206_s3 = scalar_lea.sflag [#allocation9], %s205_s7 }
  0x71   : > { %s1911_s9 = scalar_lea.vmem [#allocation8], %s1103_s8 }
  0x72   : > { %1563 = dma.done.wait (%p2275_p6), %s206_s3, 16384  }
  0x73   : > { %1565 = vsyncadd (%p2275_p6), %s206_s3, 4294950912  ;;  %v342_v0 = vld [vmem:[%s1911_s9 + $0x8] sm:$0xff]  ;;  %v344_v1 = vld [vmem:[%s1911_s9 + $0x18] sm:$0xff]  ;;  %s232_s30 = sand.u32 1, %s1576_s13   ;;  %s2276_s23 = sld [smem:[#allocation14_spill]] }
  0x74   : > { %v406_v2 = vld [vmem:[%s1911_s9 + $0x208] sm:$0xff]  ;;  %v1116_v3 = vpack.c.bf16 %v344_v1, %v342_v0  ;;  %v408_v4 = vld [vmem:[%s1911_s9 + $0x218] sm:$0xff]  ;;  %v341_v5 = vld [vmem:[%s1911_s9] sm:$0xff]  ;;  %s1104_s10 = sshll.u32 %s232_s30, 8  ;;  %s1107_s28 = sshll.u32 %s1608_s20, 1 }
  0x75   : > { %v343_v6 = vld [vmem:[%s1911_s9 + $0x10] sm:$0xff]  ;;  %v1180_v7 = vpack.c.bf16 %v408_v4, %v406_v2  ;;  %v405_v9 = vld [vmem:[%s1911_s9 + $0x200] sm:$0xff]  ;;  %v346_v11 = vld [vmem:[%s1911_s9 + $0x28] sm:$0xff]  ;;  %s2112_s14 = scalar_lea.vmem [#allocation10], %s1104_s10  ;;  %s2277_s26 = sld [smem:[#allocation19_spill]] }
  0x76   : > { %v1118_v8 = vpack.c.bf16 %v343_v6, %v341_v5  ;;  %v407_v10 = vld [vmem:[%s1911_s9 + $0x210] sm:$0xff]  ;;  %1117 = vmatprep.subr.bf16.mxu1 %v1116_v3  ;;  %v348_v13 = vld [vmem:[%s1911_s9 + $0x38] sm:$0xff]  ;;  %v410_v14 = vld [vmem:[%s1911_s9 + $0x228] sm:$0xff]  ;;  %s971_s21 = sshll.u32 %s2112_s14, 4  ;;  %s2278_s25 = sld [smem:[#allocation21_spill]]  ;;  %s2152_s21 = int_to_ptr.vmem [resolvable:$true] %s971_s21 }
  0x77   : > { %v1182_v12 = vpack.c.bf16 %v407_v10, %v405_v9  ;;  %v412_v15 = vld [vmem:[%s1911_s9 + $0x238] sm:$0xff]  ;;  %1181 = vmatprep.subr.bf16.mxu0 %v1180_v7  ;;  %v1120_v16 = vpack.c.bf16 %v348_v13, %v346_v11  ;;  %v345_v18 = vld [vmem:[%s1911_s9 + $0x20] sm:$0xff]  ;;  %v347_v19 = vld [vmem:[%s1911_s9 + $0x30] sm:$0xff]  ;;  %s2158_s7 = scalar_lea.sflag [#allocation7], %s232_s30  ;;  %s1474_s8 = scalar_lea.vmem %s2152_s21, 4096 }
  0x78   : > { %1119 = vmatpush1.bf16.msra.mxu1 %v1118_v8  ;;  %v1184_v17 = vpack.c.bf16 %v412_v15, %v410_v14  ;;  %v409_v20 = vld [vmem:[%s1911_s9 + $0x220] sm:$0xff]  ;;  %v1122_v21 = vpack.c.bf16 %v347_v19, %v345_v18  ;;  %v411_v22 = vld [vmem:[%s1911_s9 + $0x230] sm:$0xff]  ;;  %v350_v23 = vld [vmem:[%s1911_s9 + $0x48] sm:$0xff]  ;;  %p1475_p1 = scmp.ne.s32.totalorder %s2152_s21, %s1474_s8  ;;  %s1632_s3 = smov [#allocation10]  }
  0x79   : > { %1183 = vmatpush1.bf16.msra.mxu0 %v1182_v12  ;;  %v352_v24 = vld [vmem:[%s1911_s9 + $0x58] sm:$0xff]  ;;  %1121 = vmatprep.subr.bf16.mxu1 %v1120_v16  ;;  %v1186_v25 = vpack.c.bf16 %v411_v22, %v409_v20  ;;  %v414_v27 = vld [vmem:[%s1911_s9 + $0x248] sm:$0xff]  ;;  %v349_v29 = vld [vmem:[%s1911_s9 + $0x40] sm:$0xff]  ;;  %s1115_s6 = sshll.u32 %s2276_s23, 6 }
  0x7a   : > { %1185 = vmatprep.subr.bf16.mxu0 %v1184_v17  ;;  %v1124_v26 = vpack.c.bf16 %v352_v24, %v350_v23  ;;  %v416_v28 = vld [vmem:[%s1911_s9 + $0x258] sm:$0xff]  ;;  %v351_v31 = vld [vmem:[%s1911_s9 + $0x50] sm:$0xff]  ;;  %v413_v32 = vld [vmem:[%s1911_s9 + $0x240] sm:$0xff]  ;;  %s968_s4 = sadd.s32 %s1115_s6, %s1107_s28 }
  0x7b   : > { %v1188_v30 = vpack.c.bf16 %v416_v28, %v414_v27  ;;  %v415_v33 = vld [vmem:[%s1911_s9 + $0x250] sm:$0xff]  ;;  %v1126_v34 = vpack.c.bf16 %v351_v31, %v349_v29  ;;  %v354_v35 = vld [vmem:[%s1911_s9 + $0x68] sm:$0xff]  ;;  %v356_v36 = vld [vmem:[%s1911_s9 + $0x78] sm:$0xff]  ;;  %s1109_s20 = sshll.u32 %s968_s4, 7  ;;  %p2279_p12 = scmp.ne.s32.totalorder %s2277_s26, 0 }
  0x7c   : > { %1123 = vmatpush1.bf16.msra.mxu1 %v1122_v21  ;;  %v418_v37 = vld [vmem:[%s1911_s9 + $0x268] sm:$0xff]  ;;  %v1190_v38 = vpack.c.bf16 %v415_v33, %v413_v32  ;;  %v1128_v39 = vpack.c.bf16 %v356_v36, %v354_v35  ;;  %v420_v40 = vld [vmem:[%s1911_s9 + $0x278] sm:$0xff]  ;;  %v353_v41 = vld [vmem:[%s1911_s9 + $0x60] sm:$0xff] }
  0x7d   : > { %1187 = vmatpush1.bf16.msra.mxu0 %v1186_v25  ;;  %1125 = vmatprep.subr.bf16.mxu1 %v1124_v26  ;;  %v355_v42 = vld [vmem:[%s1911_s9 + $0x70] sm:$0xff]  ;;  %v1192_v43 = vpack.c.bf16 %v420_v40, %v418_v37  ;;  %v417_v44 = vld [vmem:[%s1911_s9 + $0x260] sm:$0xff]  ;;  %v358_v46 = vld [vmem:[%s1911_s9 + $0x88] sm:$0xff]  ;;  %p1476_p9 = pnand %p1475_p1, %p2279_p12 }
  0x7e   : > { %1189 = vmatprep.subr.bf16.mxu0 %v1188_v30  ;;  %v419_v45 = vld [vmem:[%s1911_s9 + $0x270] sm:$0xff]  ;;  %v360_v47 = vld [vmem:[%s1911_s9 + $0x98] sm:$0xff]  ;;  %v422_v48 = vld [vmem:[%s1911_s9 + $0x288] sm:$0xff]  ;;  %v1130_v50 = vpack.c.bf16 %v355_v42, %v353_v41 }
  0x7f   : > { %v424_v49 = vld [vmem:[%s1911_s9 + $0x298] sm:$0xff]  ;;  %v1194_v51 = vpack.c.bf16 %v419_v45, %v417_v44  ;;  %v1132_v52 = vpack.c.bf16 %v360_v47, %v358_v46  ;;  %v357_v53 = vld [vmem:[%s1911_s9 + $0x80] sm:$0xff]  ;;  %v359_v54 = vld [vmem:[%s1911_s9 + $0x90] sm:$0xff]  ;;  %p1477_p0 = pneg %p1476_p9 }
  0x80   : > { %1127 = vmatpush1.bf16.msra.mxu1 %v1126_v34  ;;  %v421_v55 = vld [vmem:[%s1911_s9 + $0x280] sm:$0xff]  ;;  %v1196_v56 = vpack.c.bf16 %v424_v49, %v422_v48  ;;  %v423_v57 = vld [vmem:[%s1911_s9 + $0x290] sm:$0xff]  ;;  %v362_v58 = vld [vmem:[%s1911_s9 + $0xa8] sm:$0xff]  ;;  %v1134_v62 = vpack.c.bf16 %v359_v54, %v357_v53 }
  0x81   : > { %1191 = vmatpush1.bf16.msra.mxu0 %v1190_v38  ;;  %1129 = vmatprep.subr.bf16.mxu1 %v1128_v39  ;;  %v364_v59 = vld [vmem:[%s1911_s9 + $0xb8] sm:$0xff]  ;;  %v426_v60 = vld [vmem:[%s1911_s9 + $0x2a8] sm:$0xff]  ;;  %v1198_v63 = vpack.c.bf16 %v423_v57, %v421_v55  ;;  %v361_v1 = vld [vmem:[%s1911_s9 + $0xa0] sm:$0xff] }
  0x82   : > { %1193 = vmatprep.subr.bf16.mxu0 %v1192_v43  ;;  %v428_v61 = vld [vmem:[%s1911_s9 + $0x2b8] sm:$0xff]  ;;  %v1136_v0 = vpack.c.bf16 %v364_v59, %v362_v58  ;;  %v363_v2 = vld [vmem:[%s1911_s9 + $0xb0] sm:$0xff]  ;;  %v425_v3 = vld [vmem:[%s1911_s9 + $0x2a0] sm:$0xff] }
  0x83   : > { %v1200_v4 = vpack.c.bf16 %v428_v61, %v426_v60  ;;  %v427_v5 = vld [vmem:[%s1911_s9 + $0x2b0] sm:$0xff]  ;;  %v366_v6 = vld [vmem:[%s1911_s9 + $0xc8] sm:$0xff]  ;;  %v368_v7 = vld [vmem:[%s1911_s9 + $0xd8] sm:$0xff]  ;;  %v1138_v10 = vpack.c.bf16 %v363_v2, %v361_v1 }
  0x84   : > { %1131 = vmatpush1.bf16.msra.mxu1 %v1130_v50  ;;  %v430_v8 = vld [vmem:[%s1911_s9 + $0x2c8] sm:$0xff]  ;;  %v432_v9 = vld [vmem:[%s1911_s9 + $0x2d8] sm:$0xff]  ;;  %v1202_v11 = vpack.c.bf16 %v427_v5, %v425_v3  ;;  %v1140_v12 = vpack.c.bf16 %v368_v7, %v366_v6  ;;  %v365_v13 = vld [vmem:[%s1911_s9 + $0xc0] sm:$0xff] }
  0x85   : > { %1195 = vmatpush1.bf16.msra.mxu0 %v1194_v51  ;;  %1133 = vmatprep.subr.bf16.mxu1 %v1132_v52  ;;  %v367_v14 = vld [vmem:[%s1911_s9 + $0xd0] sm:$0xff]  ;;  %v429_v15 = vld [vmem:[%s1911_s9 + $0x2c0] sm:$0xff]  ;;  %v1204_v16 = vpack.c.bf16 %v432_v9, %v430_v8  ;;  %v370_v18 = vld [vmem:[%s1911_s9 + $0xe8] sm:$0xff] }
  0x86   : > { %1197 = vmatprep.subr.bf16.mxu0 %v1196_v56  ;;  %v431_v17 = vld [vmem:[%s1911_s9 + $0x2d0] sm:$0xff]  ;;  %v372_v19 = vld [vmem:[%s1911_s9 + $0xf8] sm:$0xff]  ;;  %v434_v20 = vld [vmem:[%s1911_s9 + $0x2e8] sm:$0xff]  ;;  %v1142_v22 = vpack.c.bf16 %v367_v14, %v365_v13 }
  0x87   : > { %v436_v21 = vld [vmem:[%s1911_s9 + $0x2f8] sm:$0xff]  ;;  %v1206_v23 = vpack.c.bf16 %v431_v17, %v429_v15  ;;  %v1144_v24 = vpack.c.bf16 %v372_v19, %v370_v18  ;;  %v369_v25 = vld [vmem:[%s1911_s9 + $0xe0] sm:$0xff]  ;;  %v371_v26 = vld [vmem:[%s1911_s9 + $0xf0] sm:$0xff] }
  0x88   : > { %1135 = vmatpush1.bf16.msra.mxu1 %v1134_v62  ;;  %v433_v27 = vld [vmem:[%s1911_s9 + $0x2e0] sm:$0xff]  ;;  %v1208_v28 = vpack.c.bf16 %v436_v21, %v434_v20  ;;  %v435_v29 = vld [vmem:[%s1911_s9 + $0x2f0] sm:$0xff]  ;;  %v374_v30 = vld [vmem:[%s1911_s9 + $0x108] sm:$0xff]  ;;  %v1146_v34 = vpack.c.bf16 %v371_v26, %v369_v25 }
  0x89   : > { %1199 = vmatpush1.bf16.msra.mxu0 %v1198_v63  ;;  %1137 = vmatprep.subr.bf16.mxu1 %v1136_v0  ;;  %v376_v31 = vld [vmem:[%s1911_s9 + $0x118] sm:$0xff]  ;;  %v438_v32 = vld [vmem:[%s1911_s9 + $0x308] sm:$0xff]  ;;  %v1210_v35 = vpack.c.bf16 %v435_v29, %v433_v27  ;;  %v373_v37 = vld [vmem:[%s1911_s9 + $0x100] sm:$0xff] }
  0x8a   : > { %1201 = vmatprep.subr.bf16.mxu0 %v1200_v4  ;;  %v440_v33 = vld [vmem:[%s1911_s9 + $0x318] sm:$0xff]  ;;  %v1148_v36 = vpack.c.bf16 %v376_v31, %v374_v30  ;;  %v375_v38 = vld [vmem:[%s1911_s9 + $0x110] sm:$0xff]  ;;  %v437_v39 = vld [vmem:[%s1911_s9 + $0x300] sm:$0xff] }
  0x8b   : > { %v1212_v40 = vpack.c.bf16 %v440_v33, %v438_v32  ;;  %v439_v41 = vld [vmem:[%s1911_s9 + $0x310] sm:$0xff]  ;;  %v378_v42 = vld [vmem:[%s1911_s9 + $0x128] sm:$0xff]  ;;  %v380_v43 = vld [vmem:[%s1911_s9 + $0x138] sm:$0xff]  ;;  %v1150_v46 = vpack.c.bf16 %v375_v38, %v373_v37 }
  0x8c   : > { %1139 = vmatpush1.bf16.msra.mxu1 %v1138_v10  ;;  %v442_v44 = vld [vmem:[%s1911_s9 + $0x328] sm:$0xff]  ;;  %v444_v45 = vld [vmem:[%s1911_s9 + $0x338] sm:$0xff]  ;;  %v1214_v47 = vpack.c.bf16 %v439_v41, %v437_v39  ;;  %v1152_v48 = vpack.c.bf16 %v380_v43, %v378_v42  ;;  %v377_v49 = vld [vmem:[%s1911_s9 + $0x120] sm:$0xff] }
  0x8d   : > { %1203 = vmatpush1.bf16.msra.mxu0 %v1202_v11  ;;  %1141 = vmatprep.subr.bf16.mxu1 %v1140_v12  ;;  %v379_v50 = vld [vmem:[%s1911_s9 + $0x130] sm:$0xff]  ;;  %v441_v51 = vld [vmem:[%s1911_s9 + $0x320] sm:$0xff]  ;;  %v1216_v52 = vpack.c.bf16 %v444_v45, %v442_v44  ;;  %v382_v54 = vld [vmem:[%s1911_s9 + $0x148] sm:$0xff] }
  0x8e   : > { %1205 = vmatprep.subr.bf16.mxu0 %v1204_v16  ;;  %v443_v53 = vld [vmem:[%s1911_s9 + $0x330] sm:$0xff]  ;;  %v384_v55 = vld [vmem:[%s1911_s9 + $0x158] sm:$0xff]  ;;  %v446_v56 = vld [vmem:[%s1911_s9 + $0x348] sm:$0xff]  ;;  %v1154_v58 = vpack.c.bf16 %v379_v50, %v377_v49 }
  0x8f   : > { %v448_v57 = vld [vmem:[%s1911_s9 + $0x358] sm:$0xff]  ;;  %v1218_v59 = vpack.c.bf16 %v443_v53, %v441_v51  ;;  %v1156_v60 = vpack.c.bf16 %v384_v55, %v382_v54  ;;  %v381_v61 = vld [vmem:[%s1911_s9 + $0x140] sm:$0xff]  ;;  %v383_v62 = vld [vmem:[%s1911_s9 + $0x150] sm:$0xff] }
  0x90   : > { %1143 = vmatpush1.bf16.msra.mxu1 %v1142_v22  ;;  %v445_v63 = vld [vmem:[%s1911_s9 + $0x340] sm:$0xff]  ;;  %v1220_v0 = vpack.c.bf16 %v448_v57, %v446_v56  ;;  %v447_v1 = vld [vmem:[%s1911_s9 + $0x350] sm:$0xff]  ;;  %v386_v2 = vld [vmem:[%s1911_s9 + $0x168] sm:$0xff]  ;;  %v1158_v6 = vpack.c.bf16 %v383_v62, %v381_v61 }
  0x91   : > { %1207 = vmatpush1.bf16.msra.mxu0 %v1206_v23  ;;  %1145 = vmatprep.subr.bf16.mxu1 %v1144_v24  ;;  %v388_v3 = vld [vmem:[%s1911_s9 + $0x178] sm:$0xff]  ;;  %v450_v4 = vld [vmem:[%s1911_s9 + $0x368] sm:$0xff]  ;;  %v385_v7 = vld [vmem:[%s1911_s9 + $0x160] sm:$0xff]  ;;  %v1222_v8 = vpack.c.bf16 %v447_v1, %v445_v63 }
  0x92   : > { %1209 = vmatprep.subr.bf16.mxu0 %v1208_v28  ;;  %v452_v5 = vld [vmem:[%s1911_s9 + $0x378] sm:$0xff]  ;;  %v1160_v9 = vpack.c.bf16 %v388_v3, %v386_v2  ;;  %v387_v10 = vld [vmem:[%s1911_s9 + $0x170] sm:$0xff]  ;;  %v449_v11 = vld [vmem:[%s1911_s9 + $0x360] sm:$0xff] }
  0x93   : > { %v451_v12 = vld [vmem:[%s1911_s9 + $0x370] sm:$0xff]  ;;  %v1224_v13 = vpack.c.bf16 %v452_v5, %v450_v4  ;;  %v390_v14 = vld [vmem:[%s1911_s9 + $0x188] sm:$0xff]  ;;  %v392_v15 = vld [vmem:[%s1911_s9 + $0x198] sm:$0xff]  ;;  %v1162_v20 = vpack.c.bf16 %v387_v10, %v385_v7 }
  0x94   : > { %1147 = vmatpush1.bf16.msra.mxu1 %v1146_v34  ;;  %v278_v16 = vld [vmem:[%s1904_s27 + $0x8] sm:$0xff]  ;;  %v456_v18 = vld [vmem:[%s1911_s9 + $0x398] sm:$0xff]  ;;  %v1226_v21 = vpack.c.bf16 %v451_v12, %v449_v11  ;;  %v1164_v22 = vpack.c.bf16 %v392_v15, %v390_v14  ;;  %v389_v23 = vld [vmem:[%s1911_s9 + $0x180] sm:$0xff] }
  0x95   : > { %1211 = vmatpush1.bf16.msra.mxu0 %v1210_v35  ;;  %1149 = vmatprep.subr.bf16.mxu1 %v1148_v36  ;;  %v454_v17 = vld [vmem:[%s1911_s9 + $0x388] sm:$0xff]  ;;  %v280_v19 = vld [vmem:[%s1904_s27 + $0x18] sm:$0xff]  ;;  %v391_v24 = vld [vmem:[%s1911_s9 + $0x190] sm:$0xff] }
  0x96   : > { %1213 = vmatprep.subr.bf16.mxu0 %v1212_v40  ;;  %565 = vmatprep.mubr.f32.mxu1 %v278_v16  ;;  %v453_v25 = vld [vmem:[%s1911_s9 + $0x380] sm:$0xff]  ;;  %v1228_v26 = vpack.c.bf16 %v456_v18, %v454_v17  ;;  %v455_v27 = vld [vmem:[%s1911_s9 + $0x390] sm:$0xff]  ;;  %v394_v28 = vld [vmem:[%s1911_s9 + $0x1a8] sm:$0xff]  ;;  %v1166_v32 = vpack.c.bf16 %v391_v24, %v389_v23 }
  0x97   : > { %726 = vmatprep.mubr.f32.mxu0 %v280_v19  ;;  %v396_v29 = vld [vmem:[%s1911_s9 + $0x1b8] sm:$0xff]  ;;  %v458_v30 = vld [vmem:[%s1911_s9 + $0x3a8] sm:$0xff]  ;;  %v1230_v33 = vpack.c.bf16 %v455_v27, %v453_v25  ;;  %v393_v35 = vld [vmem:[%s1911_s9 + $0x1a0] sm:$0xff] }
  0x98   : > { %1151 = vmatpush1.bf16.msra.mxu1 %v1150_v46  ;;  %v460_v31 = vld [vmem:[%s1911_s9 + $0x3b8] sm:$0xff]  ;;  %v1168_v34 = vpack.c.bf16 %v396_v29, %v394_v28  ;;  %v395_v36 = vld [vmem:[%s1911_s9 + $0x1b0] sm:$0xff]  ;;  %v457_v37 = vld [vmem:[%s1911_s9 + $0x3a0] sm:$0xff] }
  0x99   : > { %1215 = vmatpush1.bf16.msra.mxu0 %v1214_v47  ;;  %1153 = vmatprep.subr.bf16.mxu1 %v1152_v48  ;;  %v1232_v38 = vpack.c.bf16 %v460_v31, %v458_v30  ;;  %v459_v39 = vld [vmem:[%s1911_s9 + $0x3b0] sm:$0xff]  ;;  %v398_v40 = vld [vmem:[%s1911_s9 + $0x1c8] sm:$0xff]  ;;  %v400_v41 = vld [vmem:[%s1911_s9 + $0x1d8] sm:$0xff]  ;;  %v1170_v44 = vpack.c.bf16 %v395_v36, %v393_v35 }
  0x9a   : > { %1217 = vmatprep.subr.bf16.mxu0 %v1216_v52  ;;  %v462_v42 = vld [vmem:[%s1911_s9 + $0x3c8] sm:$0xff]  ;;  %v464_v43 = vld [vmem:[%s1911_s9 + $0x3d8] sm:$0xff]  ;;  %v1234_v45 = vpack.c.bf16 %v459_v39, %v457_v37  ;;  %v1172_v46 = vpack.c.bf16 %v400_v41, %v398_v40  ;;  %v397_v47 = vld [vmem:[%s1911_s9 + $0x1c0] sm:$0xff] }
  0x9b   : > { %v399_v48 = vld [vmem:[%s1911_s9 + $0x1d0] sm:$0xff]  ;;  %v461_v49 = vld [vmem:[%s1911_s9 + $0x3c0] sm:$0xff]  ;;  %v1236_v50 = vpack.c.bf16 %v464_v43, %v462_v42  ;;  %v402_v52 = vld [vmem:[%s1911_s9 + $0x1e8] sm:$0xff] }
  0x9c   : > { %1155 = vmatpush1.bf16.msra.mxu1 %v1154_v58  ;;  %v463_v51 = vld [vmem:[%s1911_s9 + $0x3d0] sm:$0xff]  ;;  %v404_v53 = vld [vmem:[%s1911_s9 + $0x1f8] sm:$0xff]  ;;  %v466_v54 = vld [vmem:[%s1911_s9 + $0x3e8] sm:$0xff]  ;;  %v1174_v56 = vpack.c.bf16 %v399_v48, %v397_v47 }
  0x9d   : > { %1219 = vmatpush1.bf16.msra.mxu0 %v1218_v59  ;;  %1157 = vmatprep.subr.bf16.mxu1 %v1156_v60  ;;  %v468_v55 = vld [vmem:[%s1911_s9 + $0x3f8] sm:$0xff]  ;;  %v1238_v57 = vpack.c.bf16 %v463_v51, %v461_v49  ;;  %v1176_v58 = vpack.c.bf16 %v404_v53, %v402_v52  ;;  %v401_v59 = vld [vmem:[%s1911_s9 + $0x1e0] sm:$0xff]  ;;  %v403_v60 = vld [vmem:[%s1911_s9 + $0x1f0] sm:$0xff] }
  0x9e   : > { %1221 = vmatprep.subr.bf16.mxu0 %v1220_v0  ;;  %v1240_v61 = vpack.c.bf16 %v468_v55, %v466_v54  ;;  %v465_v62 = vld [vmem:[%s1911_s9 + $0x3e0] sm:$0xff]  ;;  %v467_v63 = vld [vmem:[%s1911_s9 + $0x3f0] sm:$0xff]  ;;  %v1178_v0 = vpack.c.bf16 %v403_v60, %v401_v59  ;;  %v282_v4 = vld [vmem:[%s1904_s27 + $0x28] sm:$0xff]  ;;  %s1478_s9 = sshll.u32 %s1632_s3, 4  ;;  %s1479_s9 = int_to_ptr.vmem [resolvable:$false] %s1478_s9 }
  0x9f   : > { %v1242_v1 = vpack.c.bf16 %v467_v63, %v465_v62  ;;  %v277_v2 = vld [vmem:[%s1904_s27] sm:$0xff]  ;;  %v279_v3 = vld [vmem:[%s1904_s27 + $0x10] sm:$0xff]  ;;  %v284_v5 = vld [vmem:[%s1904_s27 + $0x38] sm:$0xff]  ;;  %s1480_s10 = scalar_lea.vmem %s1479_s9, 8192  ;;  %p1481_p4 = scmp.lt.s32.totalorder %s2152_s21, %s1479_s9 }
  0xa0   : > { %1159 = vmatpush1.bf16.msra.mxu1 %v1158_v6  ;;  %v281_v6 = vld [vmem:[%s1904_s27 + $0x20] sm:$0xff]  ;;  %v283_v7 = vld [vmem:[%s1904_s27 + $0x30] sm:$0xff]  ;;  %v290_v12 = vld [vmem:[%s1904_s27 + $0x68] sm:$0xff]  ;;  %p1482_p10 = scmp.lt.s32.totalorder %s1480_s10, %s1474_s8 }
  0xa1   : > { %1223 = vmatpush1.bf16.msra.mxu0 %v1222_v8  ;;  %1161 = vmatprep.subr.bf16.mxu1 %v1160_v9  ;;  %v286_v8 = vld [vmem:[%s1904_s27 + $0x48] sm:$0xff]  ;;  %v288_v9 = vld [vmem:[%s1904_s27 + $0x58] sm:$0xff]  ;;  %v285_v10 = vld [vmem:[%s1904_s27 + $0x40] sm:$0xff] }
  0xa2   : > { %1225 = vmatprep.subr.bf16.mxu0 %v1224_v13  ;;  %v287_v11 = vld [vmem:[%s1904_s27 + $0x50] sm:$0xff]  ;;  %v292_v13 = vld [vmem:[%s1904_s27 + $0x78] sm:$0xff]  ;;  %v289_v14 = vld [vmem:[%s1904_s27 + $0x60] sm:$0xff]  ;;  %p1483_p8 = por %p1482_p10, %p1481_p4 }
  0xa3   : > { %v291_v15 = vld [vmem:[%s1904_s27 + $0x70] sm:$0xff]  ;;  %v294_v16 = vld [vmem:[%s1904_s27 + $0x88] sm:$0xff]  ;;  %v296_v17 = vld [vmem:[%s1904_s27 + $0x98] sm:$0xff] }
  0xa4   : > { %1163 = vmatpush1.bf16.msra.mxu1 %v1162_v20  ;;  %v293_v18 = vld [vmem:[%s1904_s27 + $0x80] sm:$0xff]  ;;  %v295_v19 = vld [vmem:[%s1904_s27 + $0x90] sm:$0xff]  ;;  %v298_v20 = vld [vmem:[%s1904_s27 + $0xa8] sm:$0xff]  ;;  %p1484_p11 = pnand %p1483_p8, %p1477_p0 }
  0xa5   : > { %1227 = vmatpush1.bf16.msra.mxu0 %v1226_v21  ;;  %1165 = vmatprep.subr.bf16.mxu1 %v1164_v22  ;;  %v300_v21 = vld [vmem:[%s1904_s27 + $0xb8] sm:$0xff]  ;;  %v297_v22 = vld [vmem:[%s1904_s27 + $0xa0] sm:$0xff]  ;;  %v299_v23 = vld [vmem:[%s1904_s27 + $0xb0] sm:$0xff] }
  0xa6   : > { %1229 = vmatprep.subr.bf16.mxu0 %v1228_v26  ;;  %v302_v24 = vld [vmem:[%s1904_s27 + $0xc8] sm:$0xff]  ;;  %v304_v25 = vld [vmem:[%s1904_s27 + $0xd8] sm:$0xff]  ;;  %v301_v26 = vld [vmem:[%s1904_s27 + $0xc0] sm:$0xff] }
  0xa7   : > { %v303_v27 = vld [vmem:[%s1904_s27 + $0xd0] sm:$0xff]  ;;  %v306_v28 = vld [vmem:[%s1904_s27 + $0xe8] sm:$0xff]  ;;  %v308_v29 = vld [vmem:[%s1904_s27 + $0xf8] sm:$0xff] }
  0xa8   : > { %1167 = vmatpush1.bf16.msra.mxu1 %v1166_v32  ;;  %v305_v30 = vld [vmem:[%s1904_s27 + $0xe0] sm:$0xff]  ;;  %v307_v31 = vld [vmem:[%s1904_s27 + $0xf0] sm:$0xff]  ;;  %v310_v32 = vld [vmem:[%s1904_s27 + $0x108] sm:$0xff] }
  0xa9   : > { %1231 = vmatpush1.bf16.msra.mxu0 %v1230_v33  ;;  %1169 = vmatprep.subr.bf16.mxu1 %v1168_v34  ;;  %v312_v33 = vld [vmem:[%s1904_s27 + $0x118] sm:$0xff]  ;;  %v309_v34 = vld [vmem:[%s1904_s27 + $0x100] sm:$0xff]  ;;  %v311_v35 = vld [vmem:[%s1904_s27 + $0x110] sm:$0xff] }
  0xaa   : > { %1233 = vmatprep.subr.bf16.mxu0 %v1232_v38  ;;  %v314_v36 = vld [vmem:[%s1904_s27 + $0x128] sm:$0xff]  ;;  %v316_v37 = vld [vmem:[%s1904_s27 + $0x138] sm:$0xff]  ;;  %v313_v38 = vld [vmem:[%s1904_s27 + $0x120] sm:$0xff] }
  0xab   : > { %v315_v39 = vld [vmem:[%s1904_s27 + $0x130] sm:$0xff]  ;;  %v318_v40 = vld [vmem:[%s1904_s27 + $0x148] sm:$0xff]  ;;  %v320_v41 = vld [vmem:[%s1904_s27 + $0x158] sm:$0xff] }
  0xac   : > { %1171 = vmatpush1.bf16.msra.mxu1 %v1170_v44  ;;  %v317_v42 = vld [vmem:[%s1904_s27 + $0x140] sm:$0xff]  ;;  %v319_v43 = vld [vmem:[%s1904_s27 + $0x150] sm:$0xff]  ;;  %v322_v44 = vld [vmem:[%s1904_s27 + $0x168] sm:$0xff] }
  0xad   : > { %1235 = vmatpush1.bf16.msra.mxu0 %v1234_v45  ;;  %1173 = vmatprep.subr.bf16.mxu1 %v1172_v46  ;;  %v324_v45 = vld [vmem:[%s1904_s27 + $0x178] sm:$0xff]  ;;  %v321_v46 = vld [vmem:[%s1904_s27 + $0x160] sm:$0xff]  ;;  %v323_v47 = vld [vmem:[%s1904_s27 + $0x170] sm:$0xff] }
  0xae   : > { %1237 = vmatprep.subr.bf16.mxu0 %v1236_v50  ;;  %v326_v48 = vld [vmem:[%s1904_s27 + $0x188] sm:$0xff]  ;;  %v328_v49 = vld [vmem:[%s1904_s27 + $0x198] sm:$0xff]  ;;  %v325_v50 = vld [vmem:[%s1904_s27 + $0x180] sm:$0xff] }
  0xaf   : > { %v327_v51 = vld [vmem:[%s1904_s27 + $0x190] sm:$0xff]  ;;  %v330_v52 = vld [vmem:[%s1904_s27 + $0x1a8] sm:$0xff]  ;;  %v332_v53 = vld [vmem:[%s1904_s27 + $0x1b8] sm:$0xff] }
  0xb0   : > { %1175 = vmatpush1.bf16.msra.mxu1 %v1174_v56  ;;  %v329_v54 = vld [vmem:[%s1904_s27 + $0x1a0] sm:$0xff]  ;;  %v331_v55 = vld [vmem:[%s1904_s27 + $0x1b0] sm:$0xff]  ;;  %v334_v56 = vld [vmem:[%s1904_s27 + $0x1c8] sm:$0xff] }
  0xb1   : > { %1239 = vmatpush1.bf16.msra.mxu0 %v1238_v57  ;;  %1177 = vmatprep.subr.bf16.mxu1 %v1176_v58  ;;  %v336_v57 = vld [vmem:[%s1904_s27 + $0x1d8] sm:$0xff]  ;;  %v333_v58 = vld [vmem:[%s1904_s27 + $0x1c0] sm:$0xff]  ;;  %v335_v59 = vld [vmem:[%s1904_s27 + $0x1d0] sm:$0xff] }
  0xb2   : > { %1241 = vmatprep.subr.bf16.mxu0 %v1240_v61  ;;  %v338_v60 = vld [vmem:[%s1904_s27 + $0x1e8] sm:$0xff]  ;;  %v340_v61 = vld [vmem:[%s1904_s27 + $0x1f8] sm:$0xff]  ;;  %v337_v62 = vld [vmem:[%s1904_s27 + $0x1e0] sm:$0xff] }
  0xb3   : > { %v339_v63 = vld [vmem:[%s1904_s27 + $0x1f0] sm:$0xff]  ;;  %s2150_s27 = scalar_lea.hbm %s2278_s25, %s1109_s20 }
  0xb4   : > { %1179 = vmatpush1.bf16.msra.mxu1 %v1178_v0 }
  0xb5   : > { %1243 = vmatpush1.bf16.msra.mxu0 %v1242_v1 }
  0xb7   : > { %566 = vmatmul.mubr.f32.vlgmr.msra.gmra.mrb[0].mxu1 %v277_v2 }
  0xb8   : > { %727 = vmatmul.mubr.f32.vlgmr.msra.gmra.mrb[0].mxu0 %v279_v3  ;;  %571 = vmatprep.mubr.f32.mxu1 %v282_v4 }
  0xb9   : > { %732 = vmatprep.mubr.f32.mxu0 %v284_v5 }
  0xbb   : > { %572 = vmatmul.mubr.f32.gmra.mrb[2].mxu1 %v281_v6 }
  0xbc   : > { %733 = vmatmul.mubr.f32.gmra.mrb[2].mxu0 %v283_v7  ;;  %577 = vmatprep.mubr.f32.mxu1 %v286_v8 }
  0xbd   : > { %738 = vmatprep.mubr.f32.mxu0 %v288_v9 }
  0xbf   : > { %578 = vmatmul.mubr.f32.gmra.mrb[4].mxu1 %v285_v10 }
  0xc0   : > { %739 = vmatmul.mubr.f32.gmra.mrb[4].mxu0 %v287_v11  ;;  %583 = vmatprep.mubr.f32.mxu1 %v290_v12 }
  0xc1   : > { %744 = vmatprep.mubr.f32.mxu0 %v292_v13 }
  0xc3   : > { %584 = vmatmul.mubr.f32.gmra.mrb[6].mxu1 %v289_v14 }
  0xc4   : > { %745 = vmatmul.mubr.f32.gmra.mrb[6].mxu0 %v291_v15  ;;  %589 = vmatprep.mubr.f32.mxu1 %v294_v16 }
  0xc5   : > { %750 = vmatprep.mubr.f32.mxu0 %v296_v17 }
  0xc7   : > { %590 = vmatmul.mubr.f32.gmra.mrb[8].mxu1 %v293_v18 }
  0xc8   : > { %751 = vmatmul.mubr.f32.gmra.mrb[8].mxu0 %v295_v19  ;;  %595 = vmatprep.mubr.f32.mxu1 %v298_v20 }
  0xc9   : > { %756 = vmatprep.mubr.f32.mxu0 %v300_v21 }
  0xcb   : > { %596 = vmatmul.mubr.f32.gmra.mrb[10].mxu1 %v297_v22 }
  0xcc   : > { %757 = vmatmul.mubr.f32.gmra.mrb[10].mxu0 %v299_v23  ;;  %601 = vmatprep.mubr.f32.mxu1 %v302_v24 }
  0xcd   : > { %762 = vmatprep.mubr.f32.mxu0 %v304_v25 }
  0xcf   : > { %602 = vmatmul.mubr.f32.gmra.mrb[12].mxu1 %v301_v26 }
  0xd0   : > { %763 = vmatmul.mubr.f32.gmra.mrb[12].mxu0 %v303_v27  ;;  %607 = vmatprep.mubr.f32.mxu1 %v306_v28 }
  0xd1   : > { %768 = vmatprep.mubr.f32.mxu0 %v308_v29 }
  0xd3   : > { %608 = vmatmul.mubr.f32.gmra.mrb[14].mxu1 %v305_v30 }
  0xd4   : > { %769 = vmatmul.mubr.f32.gmra.mrb[14].mxu0 %v307_v31  ;;  %613 = vmatprep.mubr.f32.mxu1 %v310_v32 }
  0xd5   : > { %774 = vmatprep.mubr.f32.mxu0 %v312_v33 }
  0xd7   : > { %614 = vmatmul.mubr.f32.gmra.mrb[16].mxu1 %v309_v34 }
  0xd8   : > { %775 = vmatmul.mubr.f32.gmra.mrb[16].mxu0 %v311_v35  ;;  %619 = vmatprep.mubr.f32.mxu1 %v314_v36 }
  0xd9   : > { %780 = vmatprep.mubr.f32.mxu0 %v316_v37 }
  0xdb   : > { %620 = vmatmul.mubr.f32.gmra.mrb[18].mxu1 %v313_v38 }
  0xdc   : > { %781 = vmatmul.mubr.f32.gmra.mrb[18].mxu0 %v315_v39  ;;  %625 = vmatprep.mubr.f32.mxu1 %v318_v40 }
  0xdd   : > { %786 = vmatprep.mubr.f32.mxu0 %v320_v41 }
  0xdf   : > { %626 = vmatmul.mubr.f32.gmra.mrb[20].mxu1 %v317_v42 }
  0xe0   : > { %787 = vmatmul.mubr.f32.gmra.mrb[20].mxu0 %v319_v43  ;;  %631 = vmatprep.mubr.f32.mxu1 %v322_v44 }
  0xe1   : > { %792 = vmatprep.mubr.f32.mxu0 %v324_v45 }
  0xe3   : > { %632 = vmatmul.mubr.f32.gmra.mrb[22].mxu1 %v321_v46 }
  0xe4   : > { %793 = vmatmul.mubr.f32.gmra.mrb[22].mxu0 %v323_v47  ;;  %637 = vmatprep.mubr.f32.mxu1 %v326_v48 }
  0xe5   : > { %798 = vmatprep.mubr.f32.mxu0 %v328_v49 }
  0xe7   : > { %638 = vmatmul.mubr.f32.gmra.mrb[24].mxu1 %v325_v50 }
  0xe8   : > { %799 = vmatmul.mubr.f32.gmra.mrb[24].mxu0 %v327_v51  ;;  %643 = vmatprep.mubr.f32.mxu1 %v330_v52 }
  0xe9   : > { %804 = vmatprep.mubr.f32.mxu0 %v332_v53 }
  0xeb   : > { %644 = vmatmul.mubr.f32.gmra.mrb[26].mxu1 %v329_v54 }
  0xec   : > { %805 = vmatmul.mubr.f32.gmra.mrb[26].mxu0 %v331_v55  ;;  %649 = vmatprep.mubr.f32.mxu1 %v334_v56 }
  0xed   : > { %810 = vmatprep.mubr.f32.mxu0 %v336_v57 }
  0xef   : > { %650 = vmatmul.mubr.f32.gmra.mrb[28].mxu1 %v333_v58 }
  0xf0   : > { %811 = vmatmul.mubr.f32.gmra.mrb[28].mxu0 %v335_v59  ;;  %655 = vmatprep.mubr.f32.mxu1 %v338_v60 }
  0xf1   : > { %816 = vmatprep.mubr.f32.mxu0 %v340_v61 }
  0xf3   : > { %656 = vmatmul.mubr.f32.gmra.mrb[30].mxu1 %v337_v62 }
  0xf4   : > { %817 = vmatmul.mubr.f32.gmra.mrb[30].mxu0 %v339_v63 }
 0x18a   : > { %v567_v0 = vpop.f32.mrb[0].mxu1 }
 0x18b   : > { %v728_v1 = vpop.f32.mrb[0].mxu0  ;;  %v569_v2 = vpop.f32.mrb[1].mxu1 }
 0x18c   : > { %v729_v3 = vadd.f32 %v728_v1, %v567_v0  ;;  %v730_v4 = vpop.f32.mrb[1].mxu0 }
 0x18d   : > { %v731_v5 = vadd.f32 %v730_v4, %v569_v2 }
 0x18e   : > { %922 = vst [vmem:[%s2112_s14] sm:$0xff] %v729_v3  ;;  %v573_v6 = vpop.f32.mrb[2].mxu1 }
 0x18f   : > { %923 = vst [vmem:[%s2112_s14 + $0x8] sm:$0xff] %v731_v5  ;;  %v734_v7 = vpop.f32.mrb[2].mxu0  ;;  %v575_v8 = vpop.f32.mrb[3].mxu1 }
 0x190   : > { %v735_v9 = vadd.f32 %v734_v7, %v573_v6  ;;  %v736_v10 = vpop.f32.mrb[3].mxu0 }
 0x191   : > { %v737_v11 = vadd.f32 %v736_v10, %v575_v8 }
 0x192   : > { %924 = vst [vmem:[%s2112_s14 + $0x10] sm:$0xff] %v735_v9  ;;  %v579_v12 = vpop.f32.mrb[4].mxu1 }
 0x193   : > { %925 = vst [vmem:[%s2112_s14 + $0x18] sm:$0xff] %v737_v11  ;;  %v740_v13 = vpop.f32.mrb[4].mxu0  ;;  %v581_v14 = vpop.f32.mrb[5].mxu1 }
 0x194   : > { %v741_v15 = vadd.f32 %v740_v13, %v579_v12  ;;  %v742_v16 = vpop.f32.mrb[5].mxu0 }
 0x195   : > { %v743_v17 = vadd.f32 %v742_v16, %v581_v14 }
 0x196   : > { %926 = vst [vmem:[%s2112_s14 + $0x20] sm:$0xff] %v741_v15  ;;  %v585_v18 = vpop.f32.mrb[6].mxu1 }
 0x197   : > { %927 = vst [vmem:[%s2112_s14 + $0x28] sm:$0xff] %v743_v17  ;;  %v746_v19 = vpop.f32.mrb[6].mxu0  ;;  %v587_v20 = vpop.f32.mrb[7].mxu1 }
 0x198   : > { %v747_v21 = vadd.f32 %v746_v19, %v585_v18  ;;  %v748_v22 = vpop.f32.mrb[7].mxu0 }
 0x199   : > { %v749_v23 = vadd.f32 %v748_v22, %v587_v20 }
 0x19a   : > { %928 = vst [vmem:[%s2112_s14 + $0x30] sm:$0xff] %v747_v21  ;;  %v591_v24 = vpop.f32.mrb[8].mxu1 }
 0x19b   : > { %929 = vst [vmem:[%s2112_s14 + $0x38] sm:$0xff] %v749_v23  ;;  %v752_v25 = vpop.f32.mrb[8].mxu0  ;;  %v593_v26 = vpop.f32.mrb[9].mxu1 }
 0x19c   : > { %v753_v27 = vadd.f32 %v752_v25, %v591_v24  ;;  %v754_v28 = vpop.f32.mrb[9].mxu0 }
 0x19d   : > { %v755_v29 = vadd.f32 %v754_v28, %v593_v26 }
 0x19e   : > { %930 = vst [vmem:[%s2112_s14 + $0x40] sm:$0xff] %v753_v27  ;;  %v597_v30 = vpop.f32.mrb[10].mxu1 }
 0x19f   : > { %931 = vst [vmem:[%s2112_s14 + $0x48] sm:$0xff] %v755_v29  ;;  %v758_v31 = vpop.f32.mrb[10].mxu0  ;;  %v599_v32 = vpop.f32.mrb[11].mxu1 }
 0x1a0   : > { %v759_v33 = vadd.f32 %v758_v31, %v597_v30  ;;  %v760_v34 = vpop.f32.mrb[11].mxu0 }
 0x1a1   : > { %v761_v35 = vadd.f32 %v760_v34, %v599_v32 }
 0x1a2   : > { %932 = vst [vmem:[%s2112_s14 + $0x50] sm:$0xff] %v759_v33  ;;  %v603_v36 = vpop.f32.mrb[12].mxu1 }
 0x1a3   : > { %933 = vst [vmem:[%s2112_s14 + $0x58] sm:$0xff] %v761_v35  ;;  %v764_v37 = vpop.f32.mrb[12].mxu0  ;;  %v605_v38 = vpop.f32.mrb[13].mxu1 }
 0x1a4   : > { %v765_v39 = vadd.f32 %v764_v37, %v603_v36  ;;  %v766_v40 = vpop.f32.mrb[13].mxu0 }
 0x1a5   : > { %v767_v41 = vadd.f32 %v766_v40, %v605_v38 }
 0x1a6   : > { %934 = vst [vmem:[%s2112_s14 + $0x60] sm:$0xff] %v765_v39  ;;  %v609_v42 = vpop.f32.mrb[14].mxu1 }
 0x1a7   : > { %935 = vst [vmem:[%s2112_s14 + $0x68] sm:$0xff] %v767_v41  ;;  %v770_v43 = vpop.f32.mrb[14].mxu0  ;;  %v611_v44 = vpop.f32.mrb[15].mxu1 }
 0x1a8   : > { %v771_v45 = vadd.f32 %v770_v43, %v609_v42  ;;  %v772_v46 = vpop.f32.mrb[15].mxu0 }
 0x1a9   : > { %v773_v47 = vadd.f32 %v772_v46, %v611_v44 }
 0x1aa   : > { %936 = vst [vmem:[%s2112_s14 + $0x70] sm:$0xff] %v771_v45  ;;  %v615_v48 = vpop.f32.mrb[16].mxu1 }
 0x1ab   : > { %937 = vst [vmem:[%s2112_s14 + $0x78] sm:$0xff] %v773_v47  ;;  %v776_v49 = vpop.f32.mrb[16].mxu0  ;;  %v617_v50 = vpop.f32.mrb[17].mxu1 }
 0x1ac   : > { %v777_v51 = vadd.f32 %v776_v49, %v615_v48  ;;  %v778_v52 = vpop.f32.mrb[17].mxu0 }
 0x1ad   : > { %v779_v53 = vadd.f32 %v778_v52, %v617_v50 }
 0x1ae   : > { %938 = vst [vmem:[%s2112_s14 + $0x80] sm:$0xff] %v777_v51  ;;  %v621_v54 = vpop.f32.mrb[18].mxu1 }
 0x1af   : > { %939 = vst [vmem:[%s2112_s14 + $0x88] sm:$0xff] %v779_v53  ;;  %v782_v55 = vpop.f32.mrb[18].mxu0  ;;  %v623_v56 = vpop.f32.mrb[19].mxu1 }
 0x1b0   : > { %v783_v57 = vadd.f32 %v782_v55, %v621_v54  ;;  %v784_v58 = vpop.f32.mrb[19].mxu0 }
 0x1b1   : > { %v785_v59 = vadd.f32 %v784_v58, %v623_v56 }
 0x1b2   : > { %940 = vst [vmem:[%s2112_s14 + $0x90] sm:$0xff] %v783_v57  ;;  %v627_v60 = vpop.f32.mrb[20].mxu1 }
 0x1b3   : > { %941 = vst [vmem:[%s2112_s14 + $0x98] sm:$0xff] %v785_v59  ;;  %v788_v61 = vpop.f32.mrb[20].mxu0  ;;  %v629_v62 = vpop.f32.mrb[21].mxu1 }
 0x1b4   : > { %v789_v63 = vadd.f32 %v788_v61, %v627_v60  ;;  %v790_v0 = vpop.f32.mrb[21].mxu0 }
 0x1b5   : > { %v791_v1 = vadd.f32 %v790_v0, %v629_v62 }
 0x1b6   : > { %942 = vst [vmem:[%s2112_s14 + $0xa0] sm:$0xff] %v789_v63  ;;  %v633_v2 = vpop.f32.mrb[22].mxu1 }
 0x1b7   : > { %943 = vst [vmem:[%s2112_s14 + $0xa8] sm:$0xff] %v791_v1  ;;  %v794_v3 = vpop.f32.mrb[22].mxu0  ;;  %v635_v4 = vpop.f32.mrb[23].mxu1 }
 0x1b8   : > { %v795_v5 = vadd.f32 %v794_v3, %v633_v2  ;;  %v796_v6 = vpop.f32.mrb[23].mxu0 }
 0x1b9   : > { %v797_v7 = vadd.f32 %v796_v6, %v635_v4 }
 0x1ba   : > { %944 = vst [vmem:[%s2112_s14 + $0xb0] sm:$0xff] %v795_v5  ;;  %v639_v8 = vpop.f32.mrb[24].mxu1 }
 0x1bb   : > { %945 = vst [vmem:[%s2112_s14 + $0xb8] sm:$0xff] %v797_v7  ;;  %v800_v9 = vpop.f32.mrb[24].mxu0  ;;  %v641_v10 = vpop.f32.mrb[25].mxu1 }
 0x1bc   : > { %v801_v11 = vadd.f32 %v800_v9, %v639_v8  ;;  %v802_v12 = vpop.f32.mrb[25].mxu0 }
 0x1bd   : > { %v803_v13 = vadd.f32 %v802_v12, %v641_v10 }
 0x1be   : > { %946 = vst [vmem:[%s2112_s14 + $0xc0] sm:$0xff] %v801_v11  ;;  %v645_v14 = vpop.f32.mrb[26].mxu1 }
 0x1bf   : > { %947 = vst [vmem:[%s2112_s14 + $0xc8] sm:$0xff] %v803_v13  ;;  %v806_v15 = vpop.f32.mrb[26].mxu0  ;;  %v647_v16 = vpop.f32.mrb[27].mxu1 }
 0x1c0   : > { %v807_v17 = vadd.f32 %v806_v15, %v645_v14  ;;  %v808_v18 = vpop.f32.mrb[27].mxu0 }
 0x1c1   : > { %v809_v19 = vadd.f32 %v808_v18, %v647_v16 }
 0x1c2   : > { %948 = vst [vmem:[%s2112_s14 + $0xd0] sm:$0xff] %v807_v17  ;;  %v651_v20 = vpop.f32.mrb[28].mxu1 }
 0x1c3   : > { %949 = vst [vmem:[%s2112_s14 + $0xd8] sm:$0xff] %v809_v19  ;;  %v812_v21 = vpop.f32.mrb[28].mxu0  ;;  %v653_v22 = vpop.f32.mrb[29].mxu1 }
 0x1c4   : > { %v813_v23 = vadd.f32 %v812_v21, %v651_v20  ;;  %v814_v24 = vpop.f32.mrb[29].mxu0 }
 0x1c5   : > { %v815_v25 = vadd.f32 %v814_v24, %v653_v22 }
 0x1c6   : > { %950 = vst [vmem:[%s2112_s14 + $0xe0] sm:$0xff] %v813_v23  ;;  %v657_v26 = vpop.f32.mrb[30].mxu1 }
 0x1c7   : > { %951 = vst [vmem:[%s2112_s14 + $0xe8] sm:$0xff] %v815_v25  ;;  %v818_v27 = vpop.f32.mrb[30].mxu0  ;;  %v659_v28 = vpop.f32.mrb[31].mxu1 }
 0x1c8   : > { %v819_v29 = vadd.f32 %v818_v27, %v657_v26  ;;  %v820_v30 = vpop.f32.mrb[31].mxu0 }
 0x1c9   : > { %v821_v31 = vadd.f32 %v820_v30, %v659_v28 }
 0x1ca   : > { %952 = vst [vmem:[%s2112_s14 + $0xf0] sm:$0xff] %v819_v29 }
 0x1cb   : > { %953 = vst [vmem:[%s2112_s14 + $0xf8] sm:$0xff] %v821_v31 }
 0x1cc   : > { %1487 = shalt.err (!%p1484_p11)
}
 0x1cd   : > { %s1488_s30 = scalar_lea.hbm %s2150_s27, 4096  ;;  %s1492_s28 = scalar_lea.hbm %s2278_s25, 16384 }
 0x1ce   : > { %p1489_p2 = scmp.ne.s32.totalorder %s2150_s27, %s1488_s30  ;;  %p1493_p7 = scmp.lt.u32.totalorder %s2150_s27, %s2278_s25 }
 0x1cf   : > { %p1494_p13 = scmp.lt.u32.totalorder %s1492_s28, %s1488_s30  ;;  %p1496_p1 = scmp.lt.u32.totalorder %s1488_s30, %s2150_s27 }
 0x1d0   : > { %p1490_p5 = pnand %p1489_p2, %p2279_p12 }
 0x1d1   : > { %p1495_p6 = por %p1494_p13, %p1493_p7 }
 0x1d2   : > { %p1491_p3 = pneg %p1490_p5 }
 0x1d3   : > { %p1497_p9 = por %p1496_p1, %p1495_p6 }
 0x1d5   : > { %p1498_p0 = pnand %p1497_p9, %p1491_p3 }
 0x1d7   : > { %1501 = shalt.err (!%p1498_p0)
}
 0x1d8   : > { %s1633_s20 = smov 256   ;;  %s1634_s17 = smov 512  }
 0x1d9   : > { %s1635_s11 = smov 16  }
 0x1da   : > { %1280 = dma.vmem_to_hbm [thread:$0]  (%p2279_p12), %s2152_s21, 4096, %s2150_s27, %s2158_s7, %s1633_s20, %s1634_s17, %s1635_s11  }
 0x1db PF: > { %p1294_p4 = scmp.ge.s32.totalorder %s1624_s24, 2  ;;  %s986_s8 = sand.u32 1, %s1572_s12  }
 0x1dc   : > { %p2280_p10 = scmp.ne.s32.totalorder %s2270_s29, 0  ;;  %s987_s3 = scalar_lea.sflag [#allocation7], %s986_s8 }
 0x1de   : > { %p1290_p8 = pnand %p1294_p4, %p2280_p10 }
 0x1e0   : > { %1567 = dma.done.wait (!%p1290_p8), %s987_s3, 4096  }
 0x1e1   : > { %1569 = vsyncadd (!%p1290_p8), %s987_s3, 4294963200  ;;  %s23_s24 = sadd.s32 1, %s1624_s24   ;;  %s2282_s21 = sld [smem:[#allocation18_spill]] }
 0x1e2   : > { %p2187_p11 = scmp.ge.s32.totalorder %s23_s24, 6   ;;  %s2283_s29 = sld [smem:[#allocation15_spill]] }
 0x1e3   : > { %s2284_s26 = sld [smem:[#allocation16_spill]]  ;;  %s2285_s23 = sld [smem:[#allocation17_spill]] }
 0x1e4   : > { %s2286_s12 = smov %s1576_s13  ;;  %s2287_s13 = smov %s1580_s0 }
 0x1e5   : > { %s2288_s0 = smov %s1849_s5  ;;  %s2289_s14 = smov %s1588_s15 }
 0x1e6   : > { %s2290_s15 = smov %s1592_s16  ;;  %s2292_s17 = smov %s1600_s18 }
 0x1e7   : > { %s2291_s16 = smov %s2282_s21  ;;  %s2293_s18 = smov %s1604_s19 }
 0x1e8   : > { %s2294_s19 = smov %s1846_s1  ;;  %s2295_s20 = smov %s1616_s22 }
 0x1e9   : > { %s2296_s21 = smov %s2283_s29  ;;  %s2297_s22 = smov %s2284_s26 }
 0x1ea   :  { %22 = sbr.rel (!%p2187_p11) target bundleno = 15 (0xf), region = 94 }
 0x1f1   :  { %992 = vsyncpa [#allocation6], 1 }
 0x1f2   :  { %994 = vsyncpa [#allocation6 + $0x1], 1 }
 0x1f3   :  { %995 = vsyncpa [#allocation9], 1 }
 0x1f4   :  { %997 = vsyncpa [#allocation9 + $0x1], 1 }
 0x1f5   :  { %998 = vsyncpa [#allocation7], 1 }
 0x1f6   :  { %1000 = vsyncpa [#allocation7 + $0x1], 1 }

</bundles_post_ra>
